<compile_context>
chip_gen: v5e
topology: v5e:2x2
jax: 0.10.0
libtpu: 0.0.40
codegen_flags: <defaults>
</compile_context>

<pallas_src>
import functools
import math

import jax
import jax.numpy as jnp
from jax import lax
from jax.experimental import pallas as pl
from jax.experimental.pallas import tpu as pltpu

_EPS = 1e-8
_LANES = 128
_SUBLANES = 8
# 8192 rows x 128 lanes x 4 B = 4 MiB per f32 tile; 2 inputs x 2 pipeline
# buffers = 16 MiB, within the 32 MiB VMEM limit requested below.
_MAX_TILE_ROWS = 8192


def _sisdr_kernel(ref_ref, est_ref, out_ref, acc_ref, *,
                  length, eps, tile_rows, valid_rows_last):
    """Streaming moment accumulation + SDR finalize.

    ref_ref / est_ref : (1, tile_rows, 128) VMEM tiles (native input dtype)
    out_ref           : (1, 8, 128) lane-dense per-batch output (SDR broadcast)
    acc_ref           : (5, 8, 128) f32 scratch; planes 0..4 are per-(sublane,
                        lane) partial sums of r, e, r*r, e*e, r*e.
    """
    k = pl.program_id(1)
    last = pl.num_programs(1) - 1

    @pl.when(k == 0)
    def _():
        acc_ref[...] = jnp.zeros_like(acc_ref)

    # Cast per tile (DMA stays in the input's native dtype).
    r = ref_ref[0].astype(jnp.float32)   # (tile_rows, 128)
    e = est_ref[0].astype(jnp.float32)

    groups = tile_rows // _SUBLANES

    def _accumulate(r2, e2):
        # Free sublane-split view; leading-axis sums are pure VALU adds and
        # land as full-vreg (8,128) updates into the accumulator.
        r3 = r2.reshape(groups, _SUBLANES, _LANES)
        e3 = e2.reshape(groups, _SUBLANES, _LANES)
        acc_ref[0] += jnp.sum(r3, axis=0)
        acc_ref[1] += jnp.sum(e3, axis=0)
        acc_ref[2] += jnp.sum(r3 * r3, axis=0)
        acc_ref[3] += jnp.sum(e3 * e3, axis=0)
        acc_ref[4] += jnp.sum(r3 * e3, axis=0)

    if valid_rows_last == tile_rows:
        # Every block is fully inside the array (plus explicit zero padding,
        # which contributes nothing to the raw moments): no masking at all.
        _accumulate(r, e)
    else:
        # Only the last k block overhangs the array; its OOB rows are garbage
        # and must be zeroed before accumulation.
        @pl.when(k != last)
        def _():
            _accumulate(r, e)

        @pl.when(k == last)
        def _():
            row_ids = lax.broadcasted_iota(jnp.int32, (tile_rows, _LANES), 0)
            keep = row_ids < valid_rows_last
            zero = jnp.zeros_like(r)
            _accumulate(jnp.where(keep, r, zero), jnp.where(keep, e, zero))

    @pl.when(k == last)
    def _():
        def _total(i):
            v = acc_ref[i]                              # (8, 128)
            v = jnp.sum(v, axis=0, keepdims=True)       # (1, 128) sublane reduce
            return jnp.sum(v, axis=1, keepdims=True)    # (1, 1)   lane reduce

        sr, se, srr, see, sre = (_total(i) for i in range(5))

        inv_len = 1.0 / float(length)   # true (unpadded) length
        # Centered moments (zero_mean=True).
        srr_c = srr - sr * sr * inv_len
        sre_c = sre - sr * se * inv_len
        see_c = see - se * se * inv_len

        # scaling=True; eps placement matches the PyTorch reference.
        scale = (sre_c + eps) / (srr_c + eps)
        signal = scale * scale * srr_c
        noise = see_c - 2.0 * scale * sre_c + scale * scale * srr_c

        sdr = (-10.0 / math.log(10.0)) * jnp.log(signal / noise + eps)  # (1,1)
        out_ref[0] = jnp.broadcast_to(sdr, (_SUBLANES, _LANES))


def sisdr_loss(references, estimates, *, scaling=True, reduction="mean",
               zero_mean=True, clip_min=None, weight=1.0):
    """references / estimates: (nb, C, T) arrays (PyTorch audio_data layout)."""
    # TODO(synk): kernel is specialized to scaling=True / zero_mean=True (the
    # module defaults); other configs would need tiny kernel variants.
    assert scaling and zero_mean
    nb = references.shape[0]
    refs = references.reshape(nb, -1)
    ests = estimates.reshape(nb, -1)
    L = refs.shape[1]

    itemsize = jnp.dtype(refs.dtype).itemsize
    packing = max(_SUBLANES, 32 // itemsize)   # 8 f32, 16 bf16, 32 int8/fp8

    rows = pl.cdiv(L, _LANES)
    rows_p = pl.cdiv(rows, packing) * packing  # minimal sublane alignment
    L_p = rows_p * _LANES

    def _prep(x):
        if L_p != L:
            # Minimal alignment pad only (zeros leave the raw moments
            # unchanged; the true L drives the centered-moment math).  When L
            # is already a multiple of 128*packing this is a free reshape --
            # no extra HBM pass.
            # TODO(synk): an in-kernel flat-index lane mask would remove this
            # copy for arbitrary L as well.
            x = jnp.pad(x, ((0, 0), (0, L_p - L)))
        return x.reshape(nb, rows_p, _LANES)

    refs_p = _prep(refs)
    ests_p = _prep(ests)

    tile_rows = min(_MAX_TILE_ROWS, rows_p)
    num_k = pl.cdiv(rows_p, tile_rows)
    valid_rows_last = rows_p - (num_k - 1) * tile_rows   # static

    kernel = functools.partial(
        _sisdr_kernel, length=L, eps=_EPS,
        tile_rows=tile_rows, valid_rows_last=valid_rows_last)

    cost = pl.CostEstimate(
        flops=8 * nb * L,
        transcendentals=2 * nb,
        bytes_accessed=2 * nb * L * itemsize + nb * _SUBLANES * _LANES * 4,
    )

    out = pl.pallas_call(
        kernel,
        out_shape=jax.ShapeDtypeStruct((nb, _SUBLANES, _LANES), jnp.float32),
        grid_spec=pltpu.PrefetchScalarGridSpec(
            num_scalar_prefetch=0,
            grid=(nb, num_k),
            in_specs=[
                # TODO(synk): optionally pipeline_mode=pl.Buffered(3) to hide
                # the per-batch-row init/finalize bubble (re-check VMEM).
                pl.BlockSpec((1, tile_rows, _LANES), lambda b, k: (b, k, 0)),
                pl.BlockSpec((1, tile_rows, _LANES), lambda b, k: (b, k, 0)),
            ],
            out_specs=pl.BlockSpec((1, _SUBLANES, _LANES),
                                   lambda b, k: (b, 0, 0)),
            scratch_shapes=[pltpu.VMEM((5, _SUBLANES, _LANES), jnp.float32)],
        ),
        compiler_params=pltpu.CompilerParams(
            # TODO(synk): on v7x, pltpu.CORE_PARALLEL on the batch axis (or a
            # per-core k split with a tiny moment combine) would force 2-TC
            # sharding; kept portable here.
            dimension_semantics=("parallel", "arbitrary"),
            vmem_limit_bytes=32 * 1024 * 1024),
        cost_estimate=cost,
    )(refs_p, ests_p)

    sdr = out[:, 0, 0]                      # (nb,)
    if clip_min is not None:
        sdr = jnp.maximum(sdr, clip_min)    # applied before reduction, as in torch
    if reduction == "mean":
        sdr = jnp.mean(sdr)
    elif reduction == "sum":
        sdr = jnp.sum(sdr)
    # NOTE: the PyTorch module accepts `weight` but never applies it in
    # forward(); we mirror that behavior.
    return sdr


def _sisdr_loss_ref(references, estimates):
    """Pure-JAX reference mirroring the PyTorch forward."""
    eps = 1e-8
    nb = references.shape[0]
    r = references.reshape(nb, -1).astype(jnp.float32)
    e = estimates.reshape(nb, -1).astype(jnp.float32)
    r = r - jnp.mean(r, axis=1, keepdims=True)
    e = e - jnp.mean(e, axis=1, keepdims=True)
    rp = jnp.sum(r * r, axis=1, keepdims=True) + eps
    re = jnp.sum(e * r, axis=1, keepdims=True) + eps
    scale = re / rp
    e_true = scale * r
    e_res = e - e_true
    signal = jnp.sum(e_true ** 2, axis=1, keepdims=True)
    noise = jnp.sum(e_res ** 2, axis=1, keepdims=True)
    sdr = -10.0 * jnp.log10(signal / noise + eps)
    return jnp.mean(sdr)


if __name__ == "__main__":
    key = jax.random.PRNGKey(0)
    k1, k2 = jax.random.split(key)
    nb, C, T = 2, 1, 2048
    x = jax.random.normal(k1, (nb, C, T), dtype=jnp.float32)            # references
    y = x + 0.1 * jax.random.normal(k2, (nb, C, T), dtype=jnp.float32)  # estimates

    out = sisdr_loss(x, y)
    out = jax.block_until_ready(out)

    ref = _sisdr_loss_ref(x, y)
    assert jnp.allclose(out, ref, rtol=1e-4, atol=1e-4), (out, ref)
    print("KERNEL_OK")
</pallas_src>

<mosaic_0001>
module attributes {stable_mosaic.version = 11 : i64} {
  func.func @_sisdr_kernel(%arg0: i32, %arg1: i32, %arg2: memref<1x16x128xf32, #tpu.memory_space<vmem>>, %arg3: memref<1x16x128xf32, #tpu.memory_space<vmem>>, %arg4: memref<1x8x128xf32, #tpu.memory_space<vmem>>, %arg5: memref<5x8x128xf32, #tpu.memory_space<vmem>>) attributes {dimension_semantics = [#tpu.dimension_semantics<parallel>, #tpu.dimension_semantics<arbitrary>], iteration_bounds = array<i64: 2, 1>, scalar_prefetch = 0 : i64, scratch_operands = 1 : i64, tpu.core_type = #tpu.core_type<tc>, window_params = [{transform_indices = @transform_0, window_bounds = array<i64: 1, 16, 128>}, {transform_indices = @transform_1, window_bounds = array<i64: 1, 16, 128>}, {transform_indices = @transform_2, window_bounds = array<i64: 1, 8, 128>}]} {
    %c0_i32 = arith.constant 0 : i32
    %0 = arith.cmpi eq, %arg1, %c0_i32 : i32
    %1 = arith.extui %0 : i1 to i32
    %c0_i32_0 = arith.constant 0 : i32
    %2 = arith.cmpi ne, %1, %c0_i32_0 : i32
    scf.if %2 {
      %cst_38 = arith.constant 0.000000e+00 : f32
      %50 = vector.broadcast %cst_38 : f32 to vector<5x8x128xf32>
      %c0_39 = arith.constant 0 : index
      %c0_40 = arith.constant 0 : index
      %c0_41 = arith.constant 0 : index
      %51 = vector.load %arg5[%c0_39, %c0_40, %c0_41] : memref<5x8x128xf32, #tpu.memory_space<vmem>>, vector<5x8x128xf32>
      tpu.vector_store %arg5[%c0_39, %c0_40, %c0_41], %50 {strides = array<i32>} : memref<5x8x128xf32, #tpu.memory_space<vmem>>, vector<5x8x128xf32>,
    } else {
    }
    %c0 = arith.constant 0 : index
    %c0_1 = arith.constant 0 : index
    %c0_2 = arith.constant 0 : index
    %3 = vector.load %arg2[%c0, %c0_1, %c0_2] : memref<1x16x128xf32, #tpu.memory_space<vmem>>, vector<1x16x128xf32>
    %4 = vector.shape_cast %3 : vector<1x16x128xf32> to vector<16x128xf32>
    %c0_3 = arith.constant 0 : index
    %c0_4 = arith.constant 0 : index
    %c0_5 = arith.constant 0 : index
    %5 = vector.load %arg3[%c0_3, %c0_4, %c0_5] : memref<1x16x128xf32, #tpu.memory_space<vmem>>, vector<1x16x128xf32>
    %6 = vector.shape_cast %5 : vector<1x16x128xf32> to vector<16x128xf32>
    %7 = vector.shape_cast %4 : vector<16x128xf32> to vector<2x8x128xf32>
    %8 = vector.shape_cast %6 : vector<16x128xf32> to vector<2x8x128xf32>
    %c0_6 = arith.constant 0 : index
    %c0_7 = arith.constant 0 : index
    %c0_8 = arith.constant 0 : index
    %9 = vector.load %arg5[%c0_6, %c0_7, %c0_8] : memref<5x8x128xf32, #tpu.memory_space<vmem>>, vector<1x8x128xf32>
    %10 = vector.shape_cast %9 : vector<1x8x128xf32> to vector<8x128xf32>
    %cst = arith.constant dense<0.000000e+00> : vector<8x128xf32>
    %11 = vector.multi_reduction <add>, %7, %cst [0] : vector<2x8x128xf32> to vector<8x128xf32>
    %12 = arith.addf %10, %11 : vector<8x128xf32>
    %c0_9 = arith.constant 0 : index
    %c0_10 = arith.constant 0 : index
    %c0_11 = arith.constant 0 : index
    %13 = vector.load %arg5[%c0_9, %c0_10, %c0_11] : memref<5x8x128xf32, #tpu.memory_space<vmem>>, vector<1x8x128xf32>
    %14 = vector.shape_cast %13 : vector<1x8x128xf32> to vector<8x128xf32>
    %15 = vector.shape_cast %12 : vector<8x128xf32> to vector<1x8x128xf32>
    tpu.vector_store %arg5[%c0_9, %c0_10, %c0_11], %15 {strides = array<i32>} : memref<5x8x128xf32, #tpu.memory_space<vmem>>, vector<1x8x128xf32>,
    %c1 = arith.constant 1 : index
    %c0_12 = arith.constant 0 : index
    %c0_13 = arith.constant 0 : index
    %16 = vector.load %arg5[%c1, %c0_12, %c0_13] : memref<5x8x128xf32, #tpu.memory_space<vmem>>, vector<1x8x128xf32>
    %17 = vector.shape_cast %16 : vector<1x8x128xf32> to vector<8x128xf32>
    %cst_14 = arith.constant dense<0.000000e+00> : vector<8x128xf32>
    %18 = vector.multi_reduction <add>, %8, %cst_14 [0] : vector<2x8x128xf32> to vector<8x128xf32>
    %19 = arith.addf %17, %18 : vector<8x128xf32>
    %c1_15 = arith.constant 1 : index
    %c0_16 = arith.constant 0 : index
    %c0_17 = arith.constant 0 : index
    %20 = vector.load %arg5[%c1_15, %c0_16, %c0_17] : memref<5x8x128xf32, #tpu.memory_space<vmem>>, vector<1x8x128xf32>
    %21 = vector.shape_cast %20 : vector<1x8x128xf32> to vector<8x128xf32>
    %22 = vector.shape_cast %19 : vector<8x128xf32> to vector<1x8x128xf32>
    tpu.vector_store %arg5[%c1_15, %c0_16, %c0_17], %22 {strides = array<i32>} : memref<5x8x128xf32, #tpu.memory_space<vmem>>, vector<1x8x128xf32>,
    %c2 = arith.constant 2 : index
    %c0_18 = arith.constant 0 : index
    %c0_19 = arith.constant 0 : index
    %23 = vector.load %arg5[%c2, %c0_18, %c0_19] : memref<5x8x128xf32, #tpu.memory_space<vmem>>, vector<1x8x128xf32>
    %24 = vector.shape_cast %23 : vector<1x8x128xf32> to vector<8x128xf32>
    %25 = arith.mulf %7, %7 : vector<2x8x128xf32>
    %cst_20 = arith.constant dense<0.000000e+00> : vector<8x128xf32>
    %26 = vector.multi_reduction <add>, %25, %cst_20 [0] : vector<2x8x128xf32> to vector<8x128xf32>
    %27 = arith.addf %24, %26 : vector<8x128xf32>
    %c2_21 = arith.constant 2 : index
    %c0_22 = arith.constant 0 : index
    %c0_23 = arith.constant 0 : index
    %28 = vector.load %arg5[%c2_21, %c0_22, %c0_23] : memref<5x8x128xf32, #tpu.memory_space<vmem>>, vector<1x8x128xf32>
    %29 = vector.shape_cast %28 : vector<1x8x128xf32> to vector<8x128xf32>
    %30 = vector.shape_cast %27 : vector<8x128xf32> to vector<1x8x128xf32>
    tpu.vector_store %arg5[%c2_21, %c0_22, %c0_23], %30 {strides = array<i32>} : memref<5x8x128xf32, #tpu.memory_space<vmem>>, vector<1x8x128xf32>,
    %c3 = arith.constant 3 : index
    %c0_24 = arith.constant 0 : index
    %c0_25 = arith.constant 0 : index
    %31 = vector.load %arg5[%c3, %c0_24, %c0_25] : memref<5x8x128xf32, #tpu.memory_space<vmem>>, vector<1x8x128xf32>
    %32 = vector.shape_cast %31 : vector<1x8x128xf32> to vector<8x128xf32>
    %33 = arith.mulf %8, %8 : vector<2x8x128xf32>
    %cst_26 = arith.constant dense<0.000000e+00> : vector<8x128xf32>
    %34 = vector.multi_reduction <add>, %33, %cst_26 [0] : vector<2x8x128xf32> to vector<8x128xf32>
    %35 = arith.addf %32, %34 : vector<8x128xf32>
    %c3_27 = arith.constant 3 : index
    %c0_28 = arith.constant 0 : index
    %c0_29 = arith.constant 0 : index
    %36 = vector.load %arg5[%c3_27, %c0_28, %c0_29] : memref<5x8x128xf32, #tpu.memory_space<vmem>>, vector<1x8x128xf32>
    %37 = vector.shape_cast %36 : vector<1x8x128xf32> to vector<8x128xf32>
    %38 = vector.shape_cast %35 : vector<8x128xf32> to vector<1x8x128xf32>
    tpu.vector_store %arg5[%c3_27, %c0_28, %c0_29], %38 {strides = array<i32>} : memref<5x8x128xf32, #tpu.memory_space<vmem>>, vector<1x8x128xf32>,
    %c4 = arith.constant 4 : index
    %c0_30 = arith.constant 0 : index
    %c0_31 = arith.constant 0 : index
    %39 = vector.load %arg5[%c4, %c0_30, %c0_31] : memref<5x8x128xf32, #tpu.memory_space<vmem>>, vector<1x8x128xf32>
    %40 = vector.shape_cast %39 : vector<1x8x128xf32> to vector<8x128xf32>
    %41 = arith.mulf %7, %8 : vector<2x8x128xf32>
    %cst_32 = arith.constant dense<0.000000e+00> : vector<8x128xf32>
    %42 = vector.multi_reduction <add>, %41, %cst_32 [0] : vector<2x8x128xf32> to vector<8x128xf32>
    %43 = arith.addf %40, %42 : vector<8x128xf32>
    %c4_33 = arith.constant 4 : index
    %c0_34 = arith.constant 0 : index
    %c0_35 = arith.constant 0 : index
    %44 = vector.load %arg5[%c4_33, %c0_34, %c0_35] : memref<5x8x128xf32, #tpu.memory_space<vmem>>, vector<1x8x128xf32>
    %45 = vector.shape_cast %44 : vector<1x8x128xf32> to vector<8x128xf32>
    %46 = vector.shape_cast %43 : vector<8x128xf32> to vector<1x8x128xf32>
    tpu.vector_store %arg5[%c4_33, %c0_34, %c0_35], %46 {strides = array<i32>} : memref<5x8x128xf32, #tpu.memory_space<vmem>>, vector<1x8x128xf32>,
    %c0_i32_36 = arith.constant 0 : i32
    %47 = arith.cmpi eq, %arg1, %c0_i32_36 : i32
    %48 = arith.extui %47 : i1 to i32
    %c0_i32_37 = arith.constant 0 : i32
    %49 = arith.cmpi ne, %48, %c0_i32_37 : i32
    scf.if %49 {
      %c0_38 = arith.constant 0 : index
      %c0_39 = arith.constant 0 : index
      %c0_40 = arith.constant 0 : index
      %50 = vector.load %arg5[%c0_38, %c0_39, %c0_40] : memref<5x8x128xf32, #tpu.memory_space<vmem>>, vector<1x8x128xf32>
      %51 = vector.shape_cast %50 : vector<1x8x128xf32> to vector<8x128xf32>
      %cst_41 = arith.constant dense<0.000000e+00> : vector<128xf32>
      %52 = vector.multi_reduction <add>, %51, %cst_41 [0] : vector<8x128xf32> to vector<128xf32>
      %53 = vector.shape_cast %52 : vector<128xf32> to vector<1x128xf32>
      %cst_42 = arith.constant dense<0.000000e+00> : vector<1xf32>
      %54 = vector.multi_reduction <add>, %53, %cst_42 [1] : vector<1x128xf32> to vector<1xf32>
      %55 = vector.shape_cast %54 : vector<1xf32> to vector<1x1xf32>
      %c1_43 = arith.constant 1 : index
      %c0_44 = arith.constant 0 : index
      %c0_45 = arith.constant 0 : index
      %56 = vector.load %arg5[%c1_43, %c0_44, %c0_45] : memref<5x8x128xf32, #tpu.memory_space<vmem>>, vector<1x8x128xf32>
      %57 = vector.shape_cast %56 : vector<1x8x128xf32> to vector<8x128xf32>
      %cst_46 = arith.constant dense<0.000000e+00> : vector<128xf32>
      %58 = vector.multi_reduction <add>, %57, %cst_46 [0] : vector<8x128xf32> to vector<128xf32>
      %59 = vector.shape_cast %58 : vector<128xf32> to vector<1x128xf32>
      %cst_47 = arith.constant dense<0.000000e+00> : vector<1xf32>
      %60 = vector.multi_reduction <add>, %59, %cst_47 [1] : vector<1x128xf32> to vector<1xf32>
      %61 = vector.shape_cast %60 : vector<1xf32> to vector<1x1xf32>
      %c2_48 = arith.constant 2 : index
      %c0_49 = arith.constant 0 : index
      %c0_50 = arith.constant 0 : index
      %62 = vector.load %arg5[%c2_48, %c0_49, %c0_50] : memref<5x8x128xf32, #tpu.memory_space<vmem>>, vector<1x8x128xf32>
      %63 = vector.shape_cast %62 : vector<1x8x128xf32> to vector<8x128xf32>
      %cst_51 = arith.constant dense<0.000000e+00> : vector<128xf32>
      %64 = vector.multi_reduction <add>, %63, %cst_51 [0] : vector<8x128xf32> to vector<128xf32>
      %65 = vector.shape_cast %64 : vector<128xf32> to vector<1x128xf32>
      %cst_52 = arith.constant dense<0.000000e+00> : vector<1xf32>
      %66 = vector.multi_reduction <add>, %65, %cst_52 [1] : vector<1x128xf32> to vector<1xf32>
      %67 = vector.shape_cast %66 : vector<1xf32> to vector<1x1xf32>
      %c3_53 = arith.constant 3 : index
      %c0_54 = arith.constant 0 : index
      %c0_55 = arith.constant 0 : index
      %68 = vector.load %arg5[%c3_53, %c0_54, %c0_55] : memref<5x8x128xf32, #tpu.memory_space<vmem>>, vector<1x8x128xf32>
      %69 = vector.shape_cast %68 : vector<1x8x128xf32> to vector<8x128xf32>
      %cst_56 = arith.constant dense<0.000000e+00> : vector<128xf32>
      %70 = vector.multi_reduction <add>, %69, %cst_56 [0] : vector<8x128xf32> to vector<128xf32>
      %71 = vector.shape_cast %70 : vector<128xf32> to vector<1x128xf32>
      %cst_57 = arith.constant dense<0.000000e+00> : vector<1xf32>
      %72 = vector.multi_reduction <add>, %71, %cst_57 [1] : vector<1x128xf32> to vector<1xf32>
      %73 = vector.shape_cast %72 : vector<1xf32> to vector<1x1xf32>
      %c4_58 = arith.constant 4 : index
      %c0_59 = arith.constant 0 : index
      %c0_60 = arith.constant 0 : index
      %74 = vector.load %arg5[%c4_58, %c0_59, %c0_60] : memref<5x8x128xf32, #tpu.memory_space<vmem>>, vector<1x8x128xf32>
      %75 = vector.shape_cast %74 : vector<1x8x128xf32> to vector<8x128xf32>
      %cst_61 = arith.constant dense<0.000000e+00> : vector<128xf32>
      %76 = vector.multi_reduction <add>, %75, %cst_61 [0] : vector<8x128xf32> to vector<128xf32>
      %77 = vector.shape_cast %76 : vector<128xf32> to vector<1x128xf32>
      %cst_62 = arith.constant dense<0.000000e+00> : vector<1xf32>
      %78 = vector.multi_reduction <add>, %77, %cst_62 [1] : vector<1x128xf32> to vector<1xf32>
      %79 = vector.shape_cast %78 : vector<1xf32> to vector<1x1xf32>
      %80 = arith.mulf %55, %55 : vector<1x1xf32>
      %cst_63 = arith.constant 4.8828125E-4 : f32
      %81 = vector.broadcast %cst_63 : f32 to vector<1x1xf32>
      %82 = arith.mulf %80, %81 : vector<1x1xf32>
      %83 = arith.subf %67, %82 : vector<1x1xf32>
      %84 = arith.mulf %55, %61 : vector<1x1xf32>
      %cst_64 = arith.constant 4.8828125E-4 : f32
      %85 = vector.broadcast %cst_64 : f32 to vector<1x1xf32>
      %86 = arith.mulf %84, %85 : vector<1x1xf32>
      %87 = arith.subf %79, %86 : vector<1x1xf32>
      %88 = arith.mulf %61, %61 : vector<1x1xf32>
      %cst_65 = arith.constant 4.8828125E-4 : f32
      %89 = vector.broadcast %cst_65 : f32 to vector<1x1xf32>
      %90 = arith.mulf %88, %89 : vector<1x1xf32>
      %91 = arith.subf %73, %90 : vector<1x1xf32>
      %cst_66 = arith.constant 9.99999993E-9 : f32
      %92 = vector.broadcast %cst_66 : f32 to vector<1x1xf32>
      %93 = arith.addf %87, %92 : vector<1x1xf32>
      %cst_67 = arith.constant 9.99999993E-9 : f32
      %94 = vector.broadcast %cst_67 : f32 to vector<1x1xf32>
      %95 = arith.addf %83, %94 : vector<1x1xf32>
      %96 = arith.divf %93, %95 : vector<1x1xf32>
      %97 = arith.mulf %96, %96 : vector<1x1xf32>
      %98 = arith.mulf %97, %83 : vector<1x1xf32>
      %cst_68 = arith.constant 2.000000e+00 : f32
      %99 = vector.broadcast %cst_68 : f32 to vector<1x1xf32>
      %100 = arith.mulf %99, %96 : vector<1x1xf32>
      %101 = arith.mulf %100, %87 : vector<1x1xf32>
      %102 = arith.subf %91, %101 : vector<1x1xf32>
      %103 = arith.mulf %96, %96 : vector<1x1xf32>
      %104 = arith.mulf %103, %83 : vector<1x1xf32>
      %105 = arith.addf %102, %104 : vector<1x1xf32>
      %106 = arith.divf %98, %105 : vector<1x1xf32>
      %cst_69 = arith.constant 9.99999993E-9 : f32
      %107 = vector.broadcast %cst_69 : f32 to vector<1x1xf32>
      %108 = arith.addf %106, %107 : vector<1x1xf32>
      %109 = math.log %108 : vector<1x1xf32>
      %cst_70 = arith.constant -4.34294462 : f32
      %110 = vector.broadcast %cst_70 : f32 to vector<1x1xf32>
      %111 = arith.mulf %110, %109 : vector<1x1xf32>
      %112 = vector.shape_cast %111 : vector<1x1xf32> to vector<1x1xf32>
      %113 = vector.broadcast %112 : vector<1x1xf32> to vector<8x128xf32>
      %c0_71 = arith.constant 0 : index
      %c0_72 = arith.constant 0 : index
      %c0_73 = arith.constant 0 : index
      %114 = vector.load %arg4[%c0_71, %c0_72, %c0_73] : memref<1x8x128xf32, #tpu.memory_space<vmem>>, vector<1x8x128xf32>
      %115 = vector.shape_cast %114 : vector<1x8x128xf32> to vector<8x128xf32>
      %116 = vector.shape_cast %113 : vector<8x128xf32> to vector<1x8x128xf32>
      tpu.vector_store %arg4[%c0_71, %c0_72, %c0_73], %116 {strides = array<i32>} : memref<1x8x128xf32, #tpu.memory_space<vmem>>, vector<1x8x128xf32>,
    } else {
    }
    return
  }
  func.func @transform_0(%arg0: i32, %arg1: i32) -> (i32, i32, i32) {
    %c0_i32 = arith.constant 0 : i32
    %c0_i32_0 = arith.constant 0 : i32
    return %arg0, %arg1, %c0_i32 : i32, i32, i32
  }
  func.func @transform_1(%arg0: i32, %arg1: i32) -> (i32, i32, i32) {
    %c0_i32 = arith.constant 0 : i32
    %c0_i32_0 = arith.constant 0 : i32
    return %arg0, %arg1, %c0_i32 : i32, i32, i32
  }
  func.func @transform_2(%arg0: i32, %arg1: i32) -> (i32, i32, i32) {
    %c0_i32 = arith.constant 0 : i32
    %c0_i32_0 = arith.constant 0 : i32
    %c0_i32_1 = arith.constant 0 : i32
    return %arg0, %c0_i32, %c0_i32_0 : i32, i32, i32
  }
}

</mosaic_0001>

<bundles_post_ra>
// kernel: tpu_custom_call.1
= control target key start
LH: loop header
LB: loop body
LE: loop exit
PB: predicated region body
PF: predicated region fallthrough
CT: control target
= control target key end

     0   :  { %7 = vsyncpa [#allocation4], 0  ;;  %s896_s0 = inlined_call_operand.hbm [shape: f32[2,16,128], index: 0, kind: input, shape index: {}]   ;;  %s897_s1 = inlined_call_operand.hbm [shape: f32[2,16,128], index: 1, kind: input, shape index: {}]   ;;  %s898_s2 = inlined_call_operand.hbm [shape: f32[2,8,128], index: 2, kind: output, shape index: {}]  }
   0x1   :  { %9 = vsyncpa [#allocation4 + $0x1], 0 }
   0x2   :  { %10 = vsyncpa [#allocation7], 0 }
   0x3   :  { %12 = vsyncpa [#allocation7 + $0x1], 0 }
   0x4   :  { %13 = vsyncpa [#allocation5], 0 }
   0x5   :  { %15 = vsyncpa [#allocation5 + $0x1], 0  ;;  %s754_s9 = smov 0   ;;  %s756_s10 = smov 0  }
   0x6   :  { %s758_s11 = smov 0   ;;  %s760_s12 = smov 0  }
   0x7   :  { %s762_s13 = smov 0   ;;  %s764_s14 = smov 0  }
   0x8 LB: > { %s494_s15 = sadd.s32 4294967295, %s735_s14   ;;  %s495_s16 = sadd.s32 4294967294, %s735_s14   ;;  %s735_s14 = sphi %s764_s14, %s21_s14   ;;  %s731_s13 = sphi %s762_s13, %s908_s13   ;;  %s727_s12 = sphi %s760_s12, %s907_s12   ;;  %s723_s11 = sphi %s758_s11, %s906_s11   ;;  %s719_s10 = sphi %s756_s10, %s905_s10   ;;  %s715_s9 = sphi %s754_s9, %s904_s9  }
   0x9   : > { %s33_s17 = sadd.s32 1, %s731_s13  ;;  %s42_s18 = sadd.s32 1, %s723_s11 }
   0xa   : > { %p35_p0 = scmp.ge.s32.totalorder %s33_s17, 2  ;;  %p49_p1 = scmp.ne.s32.totalorder %s723_s11, %s719_s10 }
   0xb   : > { %p50_p2 = scmp.eq.s32.totalorder %s735_s14, 0  ;;  %p55_p3 = scmp.ne.s32.totalorder %s719_s10, %s715_s9 }
   0xc   : > { %s910_s17 = smov (%p35_p0, %s33_s17), 0  ;;  %p56_p5 = scmp.eq.s32.totalorder %s494_s15, 0 }
   0xd   : > { %p795_p4 = por %p50_p2, %p49_p1  ;;  %s37_s20 = ssub.s32 %s731_s13, %s910_s17 }
   0xe   : > { %p107_p6 = scmp.eq.s32.totalorder %s494_s15, 1  ;;  %p40_p7 = scmp.eq.s32.totalorder %s37_s20, 0 }
   0xf   : > { %p801_p8 = por %p56_p5, %p55_p3  ;;  %p113_p10 = scmp.eq.s32.totalorder %s495_s16, 1 }
  0x10   : > { %p805_p9 = por %p107_p6, %p49_p1  ;;  %p497_p12 = scmp.ge.s32.totalorder %s735_s14, 2 }
  0x11   : > { %s810_s23 = scalar_select %p40_p7, %s723_s11, %s42_s18  }
  0x12   : > { %p812_p11 = por %p113_p10, %p55_p3  ;;  %p531_p13 = scmp.lt.s32.totalorder %s735_s14, 2 }
  0x13   : > { %s819_s25 = sand.u32 1, %s723_s11   ;;  %s512_s27 = sshll.u32 %s731_s13, 4 }
  0x14   : > { %s498_s26 = sshll.u32 %s819_s25, 4  ;;  %s144_s30 = scalar_lea.hbm %s896_s0, %s512_s27 }
  0x15   : > { %s137_s3 = scalar_lea.vmem [#allocation3], %s498_s26  ;;  %s145_s5 = sshll.u32 %s144_s30, 4  ;;  %s146_s5 = int_to_ptr.hbm [resolvable:$true] %s145_s5 }
  0x16   : > { %s147_s4 = sshll.u32 %s137_s3, 4  ;;  %p828_p0 = pnand %p531_p13, %p795_p4  ;;  %s148_s4 = int_to_ptr.vmem [resolvable:$true] %s147_s4 }
  0x17   : > { %p504_p1 = scmp.ge.s32.totalorder %s735_s14, 1  ;;  %s134_s7 = scalar_lea.sflag [#allocation4], %s819_s25 }
  0x18   : > { %s737_s8 = smov 128   ;;  %s738_s15 = smov 8  }
  0x19   : > { %523 = dma.hbm_to_vmem [thread:$0]  (!%p828_p0), %s146_s5, 256, %s148_s4, %s134_s7, %s737_s8, %s737_s8, %s738_s15  }
  0x1a   : > { %p179_p2 = scmp.lt.s32.totalorder %s735_s14, 3  ;;  %s168_s20 = scalar_lea.hbm %s897_s1, %s512_s27 }
  0x1b   : > { %s169_s28 = sshll.u32 %s168_s20, 4  ;;  %s161_s19 = scalar_lea.vmem [#allocation6], %s498_s26  ;;  %s170_s28 = int_to_ptr.hbm [resolvable:$true] %s169_s28 }
  0x1c   : > { %p180_p3 = pnand %p504_p1, %p179_p2  ;;  %s171_s29 = sshll.u32 %s161_s19, 4  ;;  %s172_s29 = int_to_ptr.vmem [resolvable:$true] %s171_s29 }
  0x1d   : > { %s158_s30 = scalar_lea.sflag [#allocation7], %s819_s25  ;;  %s844_s3 = sand.u32 (!%p180_p3), 1, %s719_s10  }
  0x1e   : > { %526 = dma.hbm_to_vmem [thread:$0]  (!%p828_p0), %s170_s28, 256, %s172_s29, %s158_s30, %s737_s8, %s737_s8, %s738_s15  }
  0x1f   : > { %183 = sbr.rel (%p180_p3) target bundleno = 245 (0xf5), region = 28  ;;  %s505_s4 = sshll.u32 (!%p180_p3), %s844_s3, 4 }
  0x20   : > { %s186_s5 = scalar_lea.sflag (!%p180_p3), [#allocation4], %s844_s3  ;;  %s189_s7 = scalar_lea.vmem (!%p180_p3), [#allocation3], %s505_s4 }
  0x24   : > { %702 = dma.done.wait (%p801_p8), %s186_s5, 256  }
  0x25   : > { %704 = vsyncadd (%p801_p8), %s186_s5, 4294967040  ;;  %s196_s25 = scalar_lea.sflag [#allocation7], %s844_s3  ;;  %s199_s26 = scalar_lea.vmem [#allocation6], %s505_s4 }
  0x26   : > { %706 = dma.done.wait (%p801_p8), %s196_s25, 256  }
  0x27   : > { %708 = vsyncadd (%p801_p8), %s196_s25, 4294967040  ;;  %v239_v0 = vld [vmem:[%s199_s26] sm:$0xff]  ;;  %v240_v1 = vld [vmem:[%s199_s26 + $0x8] sm:$0xff]  ;;  %s507_s21 = sshll.u32 %s844_s3, 3  ;;  %s509_s27 = sshll.u32 %s727_s12, 3 }
  0x28   : > { %v237_v2 = vld [vmem:[%s189_s7] sm:$0xff]  ;;  %v247_v3 = vadd.f32 %v240_v1, %v239_v0  ;;  %v238_v4 = vld [vmem:[%s189_s7 + $0x8] sm:$0xff]  ;;  %v259_v7 = vmul.f32 %v239_v0, %v239_v0  ;;  %v260_v11 = vmul.f32 %v240_v1, %v240_v1  ;;  %s382_s15 = scalar_lea.hbm %s898_s2, %s509_s27  ;;  %s225_s16 = scalar_lea.vmem [#allocation8], %s507_s21 }
  0x29   : > { %v266_v5 = vmul.f32 %v239_v0, %v237_v2  ;;  %v252_v6 = vmul.f32 %v237_v2, %v237_v2  ;;  %v242_v8 = vadd.f32 %v238_v4, %v237_v2  ;;  %v267_v9 = vmul.f32 %v240_v1, %v238_v4  ;;  %s384_s18 = sshll.u32 %s225_s16, 4  ;;  %s386_s20 = sshll.u32 %s382_s15, 4  ;;  %s385_s18 = int_to_ptr.vmem [resolvable:$true] %s384_s18  ;;  %s387_s20 = int_to_ptr.hbm [resolvable:$true] %s386_s20 }
  0x2a   : > { %v253_v10 = vmul.f32 %v238_v4, %v238_v4  ;;  %v284_v12 = vrot.slane %v247_v3, 4  ;;  %v261_v16 = vadd.f32 %v260_v11, %v259_v7  ;;  %s372_s28 = scalar_lea.sflag [#allocation5], %s844_s3  ;;  %s663_s19 = sshra.s32 %s387_s20, 4  ;;  %s664_s19 = int_to_ptr.hbm [resolvable:$true] %s663_s19 }
  0x2b   : > { %v275_v13 = vrot.slane %v242_v8, 4  ;;  %v268_v14 = vadd.f32 %v267_v9, %v266_v5  ;;  %s665_s29 = scalar_lea.hbm %s664_s19, 8  ;;  %s669_s4 = scalar_lea.hbm %s898_s2, 16 }
  0x2c   : > { %v254_v15 = vadd.f32 %v253_v10, %v252_v6  ;;  %v285_v17 = vadd.f32 %v284_v12, %v247_v3  ;;  %v302_v21 = vrot.slane %v261_v16, 4  ;;  %p666_p4 = scmp.ne.s32.totalorder %s664_s19, %s665_s29  ;;  %p670_p7 = scmp.lt.s32.totalorder %s664_s19, %s898_s2 }
  0x2d   : > { %v276_v18 = vadd.f32 %v275_v13, %v242_v8  ;;  %v311_v19 = vrot.slane %v268_v14, 4  ;;  %p671_p8 = scmp.lt.s32.totalorder %s669_s4, %s665_s29 }
  0x2e   : > { %v293_v20 = vrot.slane %v254_v15, 4  ;;  %v286_v22 = vrot.slane %v285_v17, 2  ;;  %v303_v26 = vadd.f32 %v302_v21, %v261_v16  ;;  %p667_p5 = pnand %p666_p4, %p805_p9 }
  0x2f   : > { %v277_v23 = vrot.slane %v276_v18, 2  ;;  %v312_v24 = vadd.f32 %v311_v19, %v268_v14  ;;  %p672_p10 = por %p671_p8, %p670_p7 }
  0x30   : > { %v294_v25 = vadd.f32 %v293_v20, %v254_v15  ;;  %v287_v27 = vadd.f32 %v286_v22, %v285_v17  ;;  %v304_v31 = vrot.slane %v303_v26, 2  ;;  %p668_p6 = pneg %p667_p5 }
  0x31   : > { %v278_v28 = vadd.f32 %v277_v23, %v276_v18  ;;  %v313_v29 = vrot.slane %v312_v24, 2 }
  0x32   : > { %v295_v30 = vrot.slane %v294_v25, 2  ;;  %v288_v32 = vrot.slane %v287_v27, 1  ;;  %v305_v36 = vadd.f32 %v304_v31, %v303_v26  ;;  %p673_p13 = pnand %p672_p10, %p668_p6 }
  0x33   : > { %v279_v33 = vrot.slane %v278_v28, 1  ;;  %v314_v34 = vadd.f32 %v313_v29, %v312_v24 }
  0x34   : > { %v296_v35 = vadd.f32 %v295_v30, %v294_v25  ;;  %v289_v37 = vadd.f32 %v288_v32, %v287_v27  ;;  %v306_v39 = vrot.slane %v305_v36, 1 }
  0x35   : > { %v280_v38 = vadd.f32 %v279_v33, %v278_v28  ;;  %v315_v40 = vrot.slane %v314_v34, 1 }
  0x36   : > { %290 = vadd.xlane.f32.xlu1 %v289_v37  ;;  %v297_v41 = vrot.slane %v296_v35, 1  ;;  %v307_v42 = vadd.f32 %v306_v39, %v305_v36 }
  0x37   : > { %281 = vadd.xlane.f32.xlu0 %v280_v38  ;;  %v316_v43 = vadd.f32 %v315_v40, %v314_v34 }
  0x38   : > { %308 = vadd.xlane.f32.xlu2 %v307_v42  ;;  %v298_v44 = vadd.f32 %v297_v41, %v296_v35 }
  0x3e   : > { %317 = vadd.xlane.f32.xlu1 %v316_v43 }
  0x3f   : > { %299 = vadd.xlane.f32.xlu0 %v298_v44 }
  0xa9   : > { %v291_v50 = vpop.xlane.xlu1 %290 }
  0xaa   : > { %v282_v45 = vpop.xlane.xlu0 %281  ;;  %v325_v62 = vmul.f32 %v291_v50, %v291_v50 }
  0xab   : > { %v319_v46 = vmul.f32 %v282_v45, %v282_v45  ;;  %v322_v52 = vmul.f32 %v291_v50, %v282_v45  ;;  %v309_v6 = vpop.xlane.xlu2 %308 }
  0xac   : > { %v326_v4 = vmul.f32 0.00048828125, %v325_v62 }
  0xad   : > { %v320_v47 = vmul.f32 0.00048828125, %v319_v46  ;;  %v323_v56 = vmul.f32 0.00048828125, %v322_v52 }
  0xae   : > { %v327_v9 = vsub.f32 %v309_v6, %v326_v4 }
  0xb1   : > { %v318_v55 = vpop.xlane.xlu1 %317 }
  0xb2   : > { %v300_v48 = vpop.xlane.xlu0 %299  ;;  %v324_v59 = vsub.f32 %v318_v55, %v323_v56 }
  0xb3   : > { %v321_v49 = vsub.f32 %v300_v48, %v320_v47 }
  0xb4   : > { %v328_v1 = vadd.f32 1e-08, %v324_v59 }
  0xb5   : > { %v329_v51 = vadd.f32 1e-08, %v321_v49 }
  0xb7   : > { %583 = vrcp.f32 %v329_v51  ;;  %v341_v58 = vand.u32 2147483648, %v329_v51  ;;  %v339_v61 = vand.u32 2147483647, %v329_v51  ;;  %vm335_vm1 = vweird.f32 %v329_v51 }
  0xb9   : > { %v342_v0 = vor.u32 1.1754944e-38, %v341_v58  ;;  %vm340_vm3 = vcmp.eq.f32.partialorder %v339_v61, 8.507059e+37 }
  0xbd   : > { %v584_v53 = vpop.eup %583 }
  0xbe   : > { %v331_v54 = vmul.f32 %v584_v53, %v329_v51  ;;  %vm336_vm0 = vweird.f32 %v584_v53 }
  0xbf   : > { %vm337_vm2 = vmor %vm335_vm1, %vm336_vm0 }
  0xc0   : > { %v332_v57 = vsub.f32 1.0, %v331_v54 }
  0xc2   : > { %v333_v60 = vmul.f32 %v584_v53, %v332_v57 }
  0xc4   : > { %v334_v63 = vadd.f32 %v584_v53, %v333_v60 }
  0xc6   : > { %v338_v2 = vsel %vm337_vm2, %v584_v53, %v334_v63 }
  0xc7   : > { %v343_v3 = vsel %vm340_vm3, %v342_v0, %v338_v2 }
  0xc8   : > { %v344_v5 = vmul.f32 %v343_v3, %v328_v1 }
  0xca   : > { %v345_v7 = vmul.f32 %v344_v5, %v344_v5  ;;  %v347_v8 = vmul.f32 2.0, %v344_v5 }
  0xcc   : > { %v348_v10 = vmul.f32 %v347_v8, %v324_v59  ;;  %v346_v11 = vmul.f32 %v345_v7, %v321_v49 }
  0xce   : > { %v349_v12 = vsub.f32 %v327_v9, %v348_v10 }
  0xd0   : > { %v350_v13 = vadd.f32 %v349_v12, %v346_v11 }
  0xd2   : > { %585 = vrcp.f32 %v350_v13  ;;  %v362_v17 = vand.u32 2147483648, %v350_v13  ;;  %v360_v19 = vand.u32 2147483647, %v350_v13  ;;  %vm356_vm5 = vweird.f32 %v350_v13 }
  0xd4   : > { %v363_v21 = vor.u32 1.1754944e-38, %v362_v17  ;;  %vm361_vm7 = vcmp.eq.f32.partialorder %v360_v19, 8.507059e+37 }
  0xd8   : > { %v586_v14 = vpop.eup %585 }
  0xd9   : > { %v352_v15 = vmul.f32 %v586_v14, %v350_v13  ;;  %vm357_vm4 = vweird.f32 %v586_v14 }
  0xda   : > { %vm358_vm6 = vmor %vm356_vm5, %vm357_vm4 }
  0xdb   : > { %v353_v16 = vsub.f32 1.0, %v352_v15 }
  0xdd   : > { %v354_v18 = vmul.f32 %v586_v14, %v353_v16 }
  0xdf   : > { %v355_v20 = vadd.f32 %v586_v14, %v354_v18 }
  0xe1   : > { %v359_v22 = vsel %vm358_vm6, %v586_v14, %v355_v20 }
  0xe2   : > { %v364_v23 = vsel %vm361_vm7, %v363_v21, %v359_v22 }
  0xe3   : > { %v365_v24 = vmul.f32 %v364_v23, %v346_v11 }
  0xe5   : > { %v366_v25 = vadd.f32 1e-08, %v365_v24 }
  0xe7   : > { %587 = vlog2.f32 %v366_v25 }
  0xed   : > { %v588_v26 = vpop.eup %587 }
  0xee   : > { %v368_v27 = vmul.f32 0.6931472, %v588_v26 }
  0xf0   : > { %v369_v28 = vmul.f32 -4.3429446, %v368_v27 }
  0xf2   : > { %370 = vst [vmem:[%s225_s16] sm:$0xff] %v369_v28 }
  0xf3   : > { %676 = shalt.err (!%p673_p13)
}
  0xf4   : > { %518 = dma.vmem_to_hbm [thread:$0]  (%p805_p9), %s385_s18, 128, %s387_s20, %s372_s28  }
  0xf5 PF: > { %s398_s3 = sand.u32 1, %s715_s9   ;;  %p528_p0 = pnand %p497_p12, %p812_p11 }
  0xf6   : > { %s399_s25 = scalar_lea.sflag [#allocation5], %s398_s3 }
  0xf7   : > { %p529_p1 = pneg %p528_p0 }
  0xf9   : > { %710 = dma.done.wait (%p529_p1), %s399_s25, 128  }
  0xfa   : > { %712 = vsyncadd (%p529_p1), %s399_s25, 4294967168  ;;  %s21_s14 = sadd.s32 1, %s735_s14   ;;  %s904_s9 = smov %s719_s10 }
  0xfb   : > { %p18_p2 = scmp.ge.s32.totalorder %s21_s14, 4   ;;  %s905_s10 = smov %s723_s11 }
  0xfc   : > { %s906_s11 = smov %s810_s23  ;;  %s907_s12 = smov %s731_s13 }
  0xfd   : > { %s908_s13 = smov %s910_s17  ;;  %20 = sbr.rel (!%p18_p2) target bundleno = 8 (0x8), region = 98 }
 0x102   :  { %405 = vsyncpa [#allocation4], 1 }
 0x103   :  { %407 = vsyncpa [#allocation4 + $0x1], 1 }
 0x104   :  { %408 = vsyncpa [#allocation7], 1 }
 0x105   :  { %410 = vsyncpa [#allocation7 + $0x1], 1 }
 0x106   :  { %411 = vsyncpa [#allocation5], 1 }
 0x107   :  { %413 = vsyncpa [#allocation5 + $0x1], 1 }

</bundles_post_ra>
